<compile_context>
chip_gen: v7x
topology: tpu7x:2x2x1
jax: 0.10.0
libtpu: 0.0.40
codegen_flags: <defaults>
</compile_context>

<pallas_src>
import math

import jax
import jax.numpy as jnp
from jax.experimental import pallas as pl
from jax.experimental.pallas import tpu as pltpu


def _bias_relu_kernel(x_ref, b_ref, o_ref):
    x = x_ref[...]          # (tile_rows, feats)
    b = b_ref[...]          # (1, feats) -> broadcast over rows
    y = x + b
    o_ref[...] = jnp.maximum(y, 0).astype(o_ref.dtype)


def _fold_factor(rows, feats, target_lanes=4096):
    """Largest divisor g of `rows` with g * feats <= target_lanes (>= 1)."""
    g = max(1, min(rows, target_lanes // max(feats, 1)))
    while g > 1 and rows % g:
        g -= 1
    return g


def _pick_tile_rows(rows, feats, itemsize, max_block_bytes):
    """Largest sublane-aligned row tile whose block fits max_block_bytes."""
    t = max_block_bytes // max(feats * itemsize, 1)
    if t >= rows:
        return rows                      # whole array in one block
    return max(8, (t // 8) * 8)          # partial blocks must be 8-aligned


def fused_bias_relu(inp, bias, training=True, *, vmem_limit_bytes=32 * 1024 * 1024):
    """out = relu(inp + bias), bias broadcast over the leading dims of inp."""
    del training  # forward output does not depend on it
    inp = jnp.asarray(inp)
    bias = jnp.asarray(bias)
    assert inp.shape[inp.ndim - bias.ndim:] == bias.shape, (
        "bias shape must match the trailing dims of inp")

    feats = max(1, int(math.prod(bias.shape)))
    rows = inp.size // feats
    x2 = inp.reshape(rows, feats)
    b1 = bias.reshape(feats)

    # Fold rows into the lane axis so blocks are lane-dense.  Correct because
    # the op is elementwise with a per-feature bias: folding just tiles the bias.
    g = _fold_factor(rows, feats)
    rows2, feats2 = rows // g, feats * g
    x2 = x2.reshape(rows2, feats2)
    b2 = jnp.tile(b1, g).reshape(1, feats2)

    # ~3/4 of the scoped VMEM limit shared by the double-buffered in+out blocks
    # (4 live blocks) -> ~6 MiB per block, well into the HBM-roofline regime.
    tile_rows = _pick_tile_rows(rows2, feats2, x2.dtype.itemsize,
                                (vmem_limit_bytes * 3 // 4) // 4)
    grid = (pl.cdiv(rows2, tile_rows),)

    out2 = pl.pallas_call(
        _bias_relu_kernel,
        out_shape=jax.ShapeDtypeStruct((rows2, feats2), inp.dtype),
        grid=grid,
        in_specs=[
            pl.BlockSpec((tile_rows, feats2), lambda i: (i, 0)),
            pl.BlockSpec((1, feats2), lambda i: (0, 0)),
        ],
        out_specs=pl.BlockSpec((tile_rows, feats2), lambda i: (i, 0)),
        compiler_params=pltpu.CompilerParams(
            dimension_semantics=("parallel",),
            vmem_limit_bytes=vmem_limit_bytes,
        ),
    )(x2, b2)

    return out2.reshape(inp.shape)


# TODO(synk): backward pass (bias_relu_bwd: grad masking + bias-grad reduction)
# is not implemented; this kernel covers the module's forward only.


if __name__ == "__main__":
    key = jax.random.PRNGKey(0)
    k1, k2, k3, k4 = jax.random.split(key, 4)

    # GAT-like node features: [num_nodes, heads, feat_per_head], bias per (head, feat).
    inp = jax.random.normal(k1, (256, 8, 16), dtype=jnp.float32)
    bias = jax.random.normal(k2, (8, 16), dtype=jnp.float32)
    out = jax.block_until_ready(fused_bias_relu(inp, bias, training=True))
    ref = jnp.maximum(inp + bias, 0.0)
    assert out.shape == inp.shape and out.dtype == inp.dtype
    assert jnp.allclose(out, ref, atol=1e-6), "bias+relu mismatch (3-D case)"

    # 2-D case with a feature dim that is not a multiple of 128.
    inp2 = jax.random.normal(k3, (100, 48), dtype=jnp.float32)
    bias2 = jax.random.normal(k4, (48,), dtype=jnp.float32)
    out2 = jax.block_until_ready(fused_bias_relu(inp2, bias2, training=False))
    ref2 = jnp.maximum(inp2 + bias2, 0.0)
    assert jnp.allclose(out2, ref2, atol=1e-6), "bias+relu mismatch (2-D case)"

    print("KERNEL_OK")
</pallas_src>

<mosaic_0001>
module attributes {stable_mosaic.version = 11 : i64} {
  func.func @_bias_relu_kernel(%arg0: i32, %arg1: memref<8x4096xf32, #tpu.memory_space<vmem>>, %arg2: memref<1x4096xf32, #tpu.memory_space<vmem>>, %arg3: memref<8x4096xf32, #tpu.memory_space<vmem>>) attributes {dimension_semantics = [#tpu.dimension_semantics<parallel>], iteration_bounds = array<i64: 1>, scalar_prefetch = 0 : i64, scratch_operands = 0 : i64, tpu.core_type = #tpu.core_type<tc>, window_params = [{transform_indices = @transform_0, window_bounds = array<i64: 8, 4096>}, {pipeline_mode = #tpu.pipeline_mode<synchronous>, transform_indices = @transform_1, window_bounds = array<i64: 1, 4096>}, {transform_indices = @transform_2, window_bounds = array<i64: 8, 4096>}]} {
    %c0 = arith.constant 0 : index
    %c0_0 = arith.constant 0 : index
    %0 = vector.load %arg1[%c0, %c0_0] : memref<8x4096xf32, #tpu.memory_space<vmem>>, vector<8x4096xf32>
    %c0_1 = arith.constant 0 : index
    %c0_2 = arith.constant 0 : index
    %1 = vector.load %arg2[%c0_1, %c0_2] : memref<1x4096xf32, #tpu.memory_space<vmem>>, vector<1x4096xf32>
    %2 = vector.broadcast %1 : vector<1x4096xf32> to vector<8x4096xf32>
    %3 = arith.addf %0, %2 : vector<8x4096xf32>
    %cst = arith.constant 0.000000e+00 : f32
    %4 = vector.broadcast %cst : f32 to vector<8x4096xf32>
    %5 = arith.maximumf %3, %4 : vector<8x4096xf32>
    %c0_3 = arith.constant 0 : index
    %c0_4 = arith.constant 0 : index
    %6 = vector.load %arg3[%c0_3, %c0_4] : memref<8x4096xf32, #tpu.memory_space<vmem>>, vector<8x4096xf32>
    tpu.vector_store %arg3[%c0_3, %c0_4], %5 {strides = array<i32>} : memref<8x4096xf32, #tpu.memory_space<vmem>>, vector<8x4096xf32>,
    return
  }
  func.func @transform_0(%arg0: i32) -> (i32, i32) {
    %c0_i32 = arith.constant 0 : i32
    %c0_i32_0 = arith.constant 0 : i32
    return %arg0, %c0_i32 : i32, i32
  }
  func.func @transform_1(%arg0: i32) -> (i32, i32) {
    %c0_i32 = arith.constant 0 : i32
    %c0_i32_0 = arith.constant 0 : i32
    %c0_i32_1 = arith.constant 0 : i32
    return %c0_i32, %c0_i32_0 : i32, i32
  }
  func.func @transform_2(%arg0: i32) -> (i32, i32) {
    %c0_i32 = arith.constant 0 : i32
    %c0_i32_0 = arith.constant 0 : i32
    return %arg0, %c0_i32 : i32, i32
  }
}

</mosaic_0001>

<bundles_post_ra>
// kernel: tpu_custom_call.1
= control target key start
LH: loop header
LB: loop body
LE: loop exit
PB: predicated region body
PF: predicated region fallthrough
CT: control target
= control target key end

     0   :  { %7 = vsyncpa [#allocation3], 0  ;;  %s525_s0 = inlined_call_operand.hbm [shape: f32[8,4096], index: 0, kind: input, shape index: {}]   ;;  %s526_s1 = inlined_call_operand.hbm [shape: f32[1,4096], index: 1, kind: input, shape index: {}]   ;;  %s527_s2 = inlined_call_operand.hbm [shape: f32[8,4096], index: 2, kind: output, shape index: {}]  }
   0x1   :  { %8 = vsyncpa [#allocation6], 0 }
   0x2   :  { %9 = vsyncpa [#allocation4], 0  ;;  %s423_s9 = smov [#allocation2]   ;;  %s424_s11 = smov [#allocation5]  }
   0x3   :  { %s16_s10 = sshll.u32 %s423_s9, 4  ;;  %s26_s12 = sshll.u32 %s424_s11, 4  ;;  %s17_s10 = int_to_ptr.vmem [resolvable:$true] %s16_s10  ;;  %s27_s12 = int_to_ptr.vmem [resolvable:$true] %s26_s12 }
   0x4   :  { %s351_s15 = scalar_lea.hbm %s525_s0, 4096 }
   0x5   :  { %p352_p0 = scmp.ne.s32.totalorder %s525_s0, %s351_s15  ;;  %p355_p1 = scmp.lt.u32.totalorder %s351_s15, %s525_s0 }
   0x7   :  { %p357_p2 = pnand %p355_p1, %p352_p0 }
   0x9   :  { %360 = shalt.err (!%p357_p2)
}
   0xa   :  { %s361_s20 = scalar_lea.vmem %s17_s10, 4096  ;;  %p366_p4 = scmp.lt.s32.totalorder %s17_s10, %s17_s10 }
   0xb   :  { %p362_p3 = scmp.ne.s32.totalorder %s17_s10, %s361_s20  ;;  %p367_p5 = scmp.lt.s32.totalorder %s361_s20, %s361_s20 }
   0xd   :  { %p368_p6 = por %p367_p5, %p366_p4 }
   0xf   :  { %p369_p7 = pnand %p368_p6, %p362_p3 }
  0x11   :  { %372 = shalt.err (!%p369_p7)
}
  0x12   :  { %19 = dma.hbm_to_vmem [thread:$0]  %s525_s0, 4096, %s17_s10, [#allocation3]  }
  0x13   :  { %s373_s25 = scalar_lea.hbm %s526_s1, 512 }
  0x14   :  { %p374_p8 = scmp.ne.s32.totalorder %s526_s1, %s373_s25  ;;  %p377_p9 = scmp.lt.u32.totalorder %s373_s25, %s526_s1 }
  0x16   :  { %p379_p10 = pnand %p377_p9, %p374_p8 }
  0x18   :  { %382 = shalt.err (!%p379_p10)
}
  0x19   :  { %s383_s30 = scalar_lea.vmem %s27_s12, 512  ;;  %p388_p12 = scmp.lt.s32.totalorder %s27_s12, %s27_s12 }
  0x1a   :  { %p384_p11 = scmp.ne.s32.totalorder %s27_s12, %s383_s30  ;;  %p389_p13 = scmp.lt.s32.totalorder %s383_s30, %s383_s30 }
  0x1c   :  { %p390_p0 = por %p389_p13, %p388_p12 }
  0x1e   :  { %p391_p1 = pnand %p390_p0, %p384_p11 }
  0x20   :  { %394 = shalt.err (!%p391_p1)
}
  0x21   :  { %29 = dma.hbm_to_vmem [thread:$0]  %s526_s1, 512, %s27_s12, [#allocation6]  }
  0x22   :  { %417 = dma.done.wait [#allocation3], 4096  }
  0x23   :  { %418 = vsyncadd [#allocation3], 4294963200 }
  0x24   :  { %419 = dma.done.wait [#allocation6], 512  }
  0x25   :  { %420 = vsyncadd [#allocation6], 4294966784  ;;  %v76_v0 = vlaneseq  ;;  %v36_v10 = vld [vmem:[#allocation2] sm:$0xff]  ;;  %v37_v12 = vld [vmem:[#allocation2 + $0x8] sm:$0xff]  ;;  %s425_s1 = smov [#allocation7]  }
  0x26   :  { %v68_v11 = vld [vmem:[#allocation5] sm:$0xff]  ;;  %v38_v15 = vld [vmem:[#allocation2 + $0x10] sm:$0xff]  ;;  %v39_v17 = vld [vmem:[#allocation2 + $0x18] sm:$0xff]  ;;  %s338_s4 = sshll.u32 %s425_s1, 4  ;;  %s339_s4 = int_to_ptr.vmem [resolvable:$true] %s338_s4 }
  0x27   :  { %v77_v1 = vshrl.u32 %v76_v0, 7  ;;  %v40_v19 = vld [vmem:[#allocation2 + $0x20] sm:$0xff]  ;;  %v41_v21 = vld [vmem:[#allocation2 + $0x28] sm:$0xff]  ;;  %v42_v23 = vld [vmem:[#allocation2 + $0x30] sm:$0xff]  ;;  %s395_s5 = scalar_lea.vmem %s339_s4, 4096  ;;  %p400_p3 = scmp.lt.s32.totalorder %s339_s4, %s339_s4 }
  0x28   :  { %v43_v25 = vld [vmem:[#allocation2 + $0x38] sm:$0xff]  ;;  %v44_v35 = vld [vmem:[#allocation2 + $0x40] sm:$0xff]  ;;  %v69_v36 = vld [vmem:[#allocation5 + $0x8] sm:$0xff]  ;;  %p396_p2 = scmp.ne.s32.totalorder %s339_s4, %s395_s5  ;;  %p401_p4 = scmp.lt.s32.totalorder %s395_s5, %s395_s5 }
  0x29   :  { %v465_v2 = vsub.s32 0, %v77_v1  ;;  %v467_v3 = vsub.s32 1, %v77_v1  ;;  %v469_v4 = vsub.s32 2, %v77_v1  ;;  %v471_v5 = vsub.s32 3, %v77_v1  ;;  %v45_v41 = vld [vmem:[#allocation2 + $0x48] sm:$0xff]  ;;  %v46_v42 = vld [vmem:[#allocation2 + $0x50] sm:$0xff] }
  0x2a   :  { %v473_v6 = vsub.s32 4, %v77_v1  ;;  %v475_v7 = vsub.s32 5, %v77_v1  ;;  %v477_v8 = vsub.s32 6, %v77_v1  ;;  %v479_v9 = vsub.s32 7, %v77_v1  ;;  %v47_v47 = vld [vmem:[#allocation2 + $0x58] sm:$0xff]  ;;  %v48_v48 = vld [vmem:[#allocation2 + $0x60] sm:$0xff]  ;;  %p402_p5 = por %p401_p4, %p400_p3 }
  0x2b   :  { %v79_v13 = vrot.slane %v68_v11, %v465_v2  ;;  %v83_v14 = vrot.slane %v68_v11, %v467_v3  ;;  %v87_v16 = vrot.slane %v68_v11, %v469_v4  ;;  %v91_v18 = vrot.slane %v68_v11, %v471_v5  ;;  %v49_v53 = vld [vmem:[#allocation2 + $0x68] sm:$0xff]  ;;  %v50_v54 = vld [vmem:[#allocation2 + $0x70] sm:$0xff]  ;;  %v51_v55 = vld [vmem:[#allocation2 + $0x78] sm:$0xff] }
  0x2c   :  { %v95_v20 = vrot.slane %v68_v11, %v473_v6  ;;  %v99_v22 = vrot.slane %v68_v11, %v475_v7  ;;  %v103_v24 = vrot.slane %v68_v11, %v477_v8  ;;  %v107_v26 = vrot.slane %v68_v11, %v479_v9  ;;  %p403_p6 = pnand %p402_p5, %p396_p2 }
  0x2d   :  { %v236_v27 = vadd.f32 %v79_v13, %v36_v10  ;;  %v237_v28 = vadd.f32 %v83_v14, %v37_v12  ;;  %v238_v29 = vadd.f32 %v87_v16, %v38_v15  ;;  %v239_v30 = vadd.f32 %v91_v18, %v39_v17  ;;  %v52_v12 = vld [vmem:[#allocation2 + $0x80] sm:$0xff]  ;;  %v70_v13 = vld [vmem:[#allocation5 + $0x10] sm:$0xff]  ;;  %v53_v18 = vld [vmem:[#allocation2 + $0x88] sm:$0xff] }
  0x2e   :  { %v240_v31 = vadd.f32 %v95_v20, %v40_v19  ;;  %v241_v32 = vadd.f32 %v99_v22, %v41_v21  ;;  %v242_v33 = vadd.f32 %v103_v24, %v42_v23  ;;  %v243_v34 = vadd.f32 %v107_v26, %v43_v25  ;;  %v54_v19 = vld [vmem:[#allocation2 + $0x90] sm:$0xff]  ;;  %v55_v24 = vld [vmem:[#allocation2 + $0x98] sm:$0xff]  ;;  %v56_v25 = vld [vmem:[#allocation2 + $0xa0] sm:$0xff] }
  0x2f   :  { %v268_v37 = vmax.f32 %v236_v27, 0.0  ;;  %v269_v38 = vmax.f32 %v237_v28, 0.0  ;;  %v270_v39 = vmax.f32 %v238_v29, 0.0  ;;  %v271_v40 = vmax.f32 %v239_v30, 0.0  ;;  %v57_v30 = vld [vmem:[#allocation2 + $0xa8] sm:$0xff] }
  0x30   :  { %v272_v43 = vmax.f32 %v240_v31, 0.0  ;;  %v273_v44 = vmax.f32 %v241_v32, 0.0  ;;  %v274_v45 = vmax.f32 %v242_v33, 0.0  ;;  %v275_v46 = vmax.f32 %v243_v34, 0.0  ;;  %v58_v31 = vld [vmem:[#allocation2 + $0xb0] sm:$0xff]  ;;  %v59_v32 = vld [vmem:[#allocation2 + $0xb8] sm:$0xff] }
  0x31   :  { %300 = vst [vmem:[#allocation7] sm:$0xff] %v268_v37  ;;  %301 = vst [vmem:[#allocation7 + $0x8] sm:$0xff] %v269_v38  ;;  %v111_v49 = vrot.slane %v69_v36, %v465_v2  ;;  %v115_v50 = vrot.slane %v69_v36, %v467_v3  ;;  %v119_v51 = vrot.slane %v69_v36, %v469_v4 }
  0x32   :  { %302 = vst [vmem:[#allocation7 + $0x10] sm:$0xff] %v270_v39  ;;  %303 = vst [vmem:[#allocation7 + $0x18] sm:$0xff] %v271_v40  ;;  %v123_v52 = vrot.slane %v69_v36, %v471_v5  ;;  %v127_v56 = vrot.slane %v69_v36, %v473_v6  ;;  %v131_v57 = vrot.slane %v69_v36, %v475_v7 }
  0x33   :  { %304 = vst [vmem:[#allocation7 + $0x20] sm:$0xff] %v272_v43  ;;  %305 = vst [vmem:[#allocation7 + $0x28] sm:$0xff] %v273_v44  ;;  %v135_v58 = vrot.slane %v69_v36, %v477_v8  ;;  %v139_v59 = vrot.slane %v69_v36, %v479_v9  ;;  %v244_v60 = vadd.f32 %v111_v49, %v44_v35 }
  0x34   :  { %306 = vst [vmem:[#allocation7 + $0x30] sm:$0xff] %v274_v45  ;;  %307 = vst [vmem:[#allocation7 + $0x38] sm:$0xff] %v275_v46  ;;  %v245_v61 = vadd.f32 %v115_v50, %v45_v41  ;;  %v246_v62 = vadd.f32 %v119_v51, %v46_v42  ;;  %v247_v63 = vadd.f32 %v123_v52, %v47_v47  ;;  %v60_v45 = vld [vmem:[#allocation2 + $0xc0] sm:$0xff]  ;;  %v71_v46 = vld [vmem:[#allocation5 + $0x18] sm:$0xff] }
  0x35   :  { %v248_v0 = vadd.f32 %v127_v56, %v48_v48  ;;  %v249_v1 = vadd.f32 %v131_v57, %v49_v53  ;;  %v250_v10 = vadd.f32 %v135_v58, %v50_v54  ;;  %v251_v11 = vadd.f32 %v139_v59, %v51_v55  ;;  %v61_v51 = vld [vmem:[#allocation2 + $0xc8] sm:$0xff]  ;;  %v62_v52 = vld [vmem:[#allocation2 + $0xd0] sm:$0xff]  ;;  %v63_v57 = vld [vmem:[#allocation2 + $0xd8] sm:$0xff] }
  0x36   :  { %v276_v14 = vmax.f32 %v244_v60, 0.0  ;;  %v277_v15 = vmax.f32 %v245_v61, 0.0  ;;  %v278_v16 = vmax.f32 %v246_v62, 0.0  ;;  %v279_v17 = vmax.f32 %v247_v63, 0.0  ;;  %v64_v58 = vld [vmem:[#allocation2 + $0xe0] sm:$0xff]  ;;  %v65_v63 = vld [vmem:[#allocation2 + $0xe8] sm:$0xff] }
  0x37   :  { %v280_v20 = vmax.f32 %v248_v0, 0.0  ;;  %v281_v21 = vmax.f32 %v249_v1, 0.0  ;;  %v282_v22 = vmax.f32 %v250_v10, 0.0  ;;  %v283_v23 = vmax.f32 %v251_v11, 0.0  ;;  %v66_v0 = vld [vmem:[#allocation2 + $0xf0] sm:$0xff]  ;;  %v67_v1 = vld [vmem:[#allocation2 + $0xf8] sm:$0xff] }
  0x38   :  { %308 = vst [vmem:[#allocation7 + $0x40] sm:$0xff] %v276_v14  ;;  %309 = vst [vmem:[#allocation7 + $0x48] sm:$0xff] %v277_v15  ;;  %v143_v26 = vrot.slane %v70_v13, %v465_v2  ;;  %v147_v27 = vrot.slane %v70_v13, %v467_v3  ;;  %v151_v28 = vrot.slane %v70_v13, %v469_v4 }
  0x39   :  { %310 = vst [vmem:[#allocation7 + $0x50] sm:$0xff] %v278_v16  ;;  %311 = vst [vmem:[#allocation7 + $0x58] sm:$0xff] %v279_v17  ;;  %v155_v29 = vrot.slane %v70_v13, %v471_v5  ;;  %v159_v33 = vrot.slane %v70_v13, %v473_v6  ;;  %v163_v34 = vrot.slane %v70_v13, %v475_v7 }
  0x3a   :  { %312 = vst [vmem:[#allocation7 + $0x60] sm:$0xff] %v280_v20  ;;  %313 = vst [vmem:[#allocation7 + $0x68] sm:$0xff] %v281_v21  ;;  %v167_v35 = vrot.slane %v70_v13, %v477_v8  ;;  %v171_v36 = vrot.slane %v70_v13, %v479_v9  ;;  %v252_v37 = vadd.f32 %v143_v26, %v52_v12 }
  0x3b   :  { %314 = vst [vmem:[#allocation7 + $0x70] sm:$0xff] %v282_v22  ;;  %315 = vst [vmem:[#allocation7 + $0x78] sm:$0xff] %v283_v23  ;;  %v253_v38 = vadd.f32 %v147_v27, %v53_v18  ;;  %v254_v39 = vadd.f32 %v151_v28, %v54_v19  ;;  %v255_v40 = vadd.f32 %v155_v29, %v55_v24 }
  0x3c   :  { %v256_v41 = vadd.f32 %v159_v33, %v56_v25  ;;  %v257_v42 = vadd.f32 %v163_v34, %v57_v30  ;;  %v258_v43 = vadd.f32 %v167_v35, %v58_v31  ;;  %v259_v44 = vadd.f32 %v171_v36, %v59_v32 }
  0x3d   :  { %v284_v47 = vmax.f32 %v252_v37, 0.0  ;;  %v285_v48 = vmax.f32 %v253_v38, 0.0  ;;  %v286_v49 = vmax.f32 %v254_v39, 0.0  ;;  %v287_v50 = vmax.f32 %v255_v40, 0.0 }
  0x3e   :  { %v288_v53 = vmax.f32 %v256_v41, 0.0  ;;  %v289_v54 = vmax.f32 %v257_v42, 0.0  ;;  %v290_v55 = vmax.f32 %v258_v43, 0.0  ;;  %v291_v56 = vmax.f32 %v259_v44, 0.0 }
  0x3f   :  { %316 = vst [vmem:[#allocation7 + $0x80] sm:$0xff] %v284_v47  ;;  %317 = vst [vmem:[#allocation7 + $0x88] sm:$0xff] %v285_v48  ;;  %v175_v59 = vrot.slane %v71_v46, %v465_v2  ;;  %v179_v60 = vrot.slane %v71_v46, %v467_v3  ;;  %v183_v61 = vrot.slane %v71_v46, %v469_v4 }
  0x40   :  { %318 = vst [vmem:[#allocation7 + $0x90] sm:$0xff] %v286_v49  ;;  %319 = vst [vmem:[#allocation7 + $0x98] sm:$0xff] %v287_v50  ;;  %v187_v62 = vrot.slane %v71_v46, %v471_v5  ;;  %v191_v10 = vrot.slane %v71_v46, %v473_v6  ;;  %v195_v11 = vrot.slane %v71_v46, %v475_v7 }
  0x41   :  { %320 = vst [vmem:[#allocation7 + $0xa0] sm:$0xff] %v288_v53  ;;  %321 = vst [vmem:[#allocation7 + $0xa8] sm:$0xff] %v289_v54  ;;  %v199_v12 = vrot.slane %v71_v46, %v477_v8  ;;  %v203_v2 = vrot.slane %v71_v46, %v479_v9  ;;  %v260_v3 = vadd.f32 %v175_v59, %v60_v45 }
  0x42   :  { %322 = vst [vmem:[#allocation7 + $0xb0] sm:$0xff] %v290_v55  ;;  %323 = vst [vmem:[#allocation7 + $0xb8] sm:$0xff] %v291_v56  ;;  %v261_v13 = vadd.f32 %v179_v60, %v61_v51  ;;  %v262_v4 = vadd.f32 %v183_v61, %v62_v52  ;;  %v263_v14 = vadd.f32 %v187_v62, %v63_v57 }
  0x43   :  { %v264_v5 = vadd.f32 %v191_v10, %v64_v58  ;;  %v265_v15 = vadd.f32 %v195_v11, %v65_v63  ;;  %v266_v16 = vadd.f32 %v199_v12, %v66_v0  ;;  %v267_v17 = vadd.f32 %v203_v2, %v67_v1 }
  0x44   :  { %v292_v18 = vmax.f32 %v260_v3, 0.0  ;;  %v293_v19 = vmax.f32 %v261_v13, 0.0  ;;  %v294_v20 = vmax.f32 %v262_v4, 0.0  ;;  %v295_v6 = vmax.f32 %v263_v14, 0.0 }
  0x45   :  { %v296_v21 = vmax.f32 %v264_v5, 0.0  ;;  %v297_v7 = vmax.f32 %v265_v15, 0.0  ;;  %v298_v22 = vmax.f32 %v266_v16, 0.0  ;;  %v299_v8 = vmax.f32 %v267_v17, 0.0 }
  0x46   :  { %324 = vst [vmem:[#allocation7 + $0xc0] sm:$0xff] %v292_v18  ;;  %325 = vst [vmem:[#allocation7 + $0xc8] sm:$0xff] %v293_v19 }
  0x47   :  { %326 = vst [vmem:[#allocation7 + $0xd0] sm:$0xff] %v294_v20  ;;  %327 = vst [vmem:[#allocation7 + $0xd8] sm:$0xff] %v295_v6 }
  0x48   :  { %328 = vst [vmem:[#allocation7 + $0xe0] sm:$0xff] %v296_v21  ;;  %329 = vst [vmem:[#allocation7 + $0xe8] sm:$0xff] %v297_v7 }
  0x49   :  { %330 = vst [vmem:[#allocation7 + $0xf0] sm:$0xff] %v298_v22  ;;  %331 = vst [vmem:[#allocation7 + $0xf8] sm:$0xff] %v299_v8 }
  0x4a   :  { %406 = shalt.err (!%p403_p6)
}
  0x4b   :  { %s407_s8 = scalar_lea.hbm %s527_s2, 4096 }
  0x4c   :  { %p408_p7 = scmp.ne.s32.totalorder %s527_s2, %s407_s8  ;;  %p411_p8 = scmp.lt.u32.totalorder %s407_s8, %s527_s2 }
  0x4e   :  { %p413_p9 = pnand %p411_p8, %p408_p7 }
  0x50   :  { %416 = shalt.err (!%p413_p9)
}
  0x51   :  { %341 = dma.vmem_to_hbm [thread:$0]  %s339_s4, 4096, %s527_s2, [#allocation4]  }
  0x52   :  { %421 = dma.done.wait [#allocation4], 4096  }
  0x53   :  { %422 = vsyncadd [#allocation4], 4294963200 }
  0x54   :  { %345 = vsyncpa [#allocation3], 1 }
  0x55   :  { %346 = vsyncpa [#allocation6], 1 }
  0x56   :  { %347 = vsyncpa [#allocation4], 1 }

</bundles_post_ra>
